<compile_context>
chip_gen: v7x
topology: tpu7x:2x2x1
jax: 0.10.0
libtpu: 0.0.40
codegen_flags: <defaults>
</compile_context>

<pallas_src>
import functools

import jax
import jax.numpy as jnp
from jax.experimental import pallas as pl
from jax.experimental.pallas import tpu as pltpu

_CLAMP = 88.0  # |x| <= 88 keeps exp(x) finite in f32 (exp(88) ~ 1.65e38 < 3.4e38)


def _round_up(x, m):
    return ((x + m - 1) // m) * m


def _lsep_kernel(s_smem, l_smem, s_ref, l_ref, out_ref, *, c, c_pad, chunk):
    """One program = one (batch row, i-chunk).

    s_smem / l_smem : SMEM scalar-prefetch refs, full (B, c_pad) scores / labels.
    s_ref  / l_ref  : VMEM blocks (1, c_pad//128, 128) — dense row for batch b.
    out_ref         : (1, 1, 1, 1) partial pair-sum for this (b, i-chunk).
    """
    b = pl.program_id(0)
    ic = pl.program_id(1)
    s8 = c_pad // 128

    s2 = s_ref[0]  # (s8, 128) f32, zero-padded tail
    l2 = l_ref[0]  # (s8, 128) f32, zero-padded tail

    # Validity mask for the zero-padded tail of the class axis.
    k = (jax.lax.broadcasted_iota(jnp.int32, (s8, 128), 0) * 128
         + jax.lax.broadcasted_iota(jnp.int32, (s8, 128), 1))
    valid = k < c

    # Per-batch midpoint shift m: exp(s_i - m) * exp(m - s_j) == exp(s_i - s_j).
    big = jnp.float32(3.0e38)
    m = 0.5 * (jnp.max(jnp.where(valid, s2, -big), keepdims=True)
               + jnp.min(jnp.where(valid, s2, big), keepdims=True))  # (1, 1)

    # exp(m - s_j) for the whole class row, computed once (O(C) transcendentals).
    # Clamping keeps every factor finite, so inf * 0 -> NaN can never appear;
    # padded classes are forced to exactly 0 so they contribute nothing as j.
    e_neg = jnp.where(valid,
                      jnp.exp(jnp.clip(m - s2, -_CLAMP, _CLAMP)),
                      0.0)  # (s8, 128)

    # Loop over this program's chunk of (valid) i classes.  Per pair the work is
    # pure VPU (compare, select, scale, accumulate); the cross-lane reduce is
    # deferred to a single jnp.sum after the loop.
    i_lo = ic * chunk
    i_hi = jnp.minimum(i_lo + chunk, c)

    def body(i, acc):
        l_i = l_smem[b, i]                                            # scalar (SMEM)
        w_i = jnp.exp(jnp.clip(s_smem[b, i] - m, -_CLAMP, _CLAMP))    # (1, 1) = exp(s_i - m)
        return acc + jnp.where(l2 > l_i, e_neg, 0.0) * w_i

    acc = jax.lax.fori_loop(i_lo, i_hi, body,
                            jnp.zeros((s8, 128), jnp.float32))
    out_ref[0, 0] = jnp.sum(acc, keepdims=True)  # single deferred reduce -> (1, 1)


def lsep_loss(scores, labels, reduction="mean"):
    """scores: (B, C) float, labels: (B, C) float. Returns the scalar LSEP loss."""
    if reduction not in ("mean", "none"):
        raise NotImplementedError(reduction)

    scores = scores.astype(jnp.float32)
    labels = labels.astype(jnp.float32)
    B, C = scores.shape

    c_pad = max(128, _round_up(C, 128))
    pad = c_pad - C
    if pad:
        scores_p = jnp.pad(scores, ((0, 0), (0, pad)))   # zero padding; masked in-kernel
        labels_p = jnp.pad(labels, ((0, 0), (0, pad)))
    else:
        scores_p, labels_p = scores, labels

    s8 = c_pad // 128
    s3 = scores_p.reshape(B, s8, 128)  # free row-major reshape -> dense (s8, 128) blocks
    l3 = labels_p.reshape(B, s8, 128)

    # Keep both v7x TensorCores busy when B alone cannot (B == 1 or odd B): split the
    # i axis into 2 independent, 'parallel' chunks; otherwise one program per row.
    ni = 2 if (B % 2) else 1
    chunk = -(-C // ni)

    kernel = functools.partial(_lsep_kernel, c=C, c_pad=c_pad, chunk=chunk)
    partials = pl.pallas_call(
        kernel,
        out_shape=jax.ShapeDtypeStruct((B, ni, 1, 1), jnp.float32),
        grid_spec=pltpu.PrefetchScalarGridSpec(
            num_scalar_prefetch=2,           # scores, labels -> SMEM for scalar reads
            grid=(B, ni),
            in_specs=[
                pl.BlockSpec((1, s8, 128), lambda b, ic, s_sm, l_sm: (b, 0, 0)),
                pl.BlockSpec((1, s8, 128), lambda b, ic, s_sm, l_sm: (b, 0, 0)),
            ],
            out_specs=pl.BlockSpec((1, 1, 1, 1),
                                   lambda b, ic, s_sm, l_sm: (b, ic, 0, 0)),
        ),
        compiler_params=pltpu.CompilerParams(
            dimension_semantics=("parallel", "parallel"),
        ),
        cost_estimate=pl.CostEstimate(
            flops=4 * B * C * c_pad,
            transcendentals=B * (ni * c_pad + C),
            bytes_accessed=16 * B * c_pad + 4 * B * ni,
        ),
    )(scores_p, labels_p, s3, l3)

    # Tiny final reduction + log in plain JAX (keeps every kernel grid axis parallel).
    return jnp.log(jnp.sum(partials) + 1.0)


def _lsep_ref(scores, labels):
    scores = scores.astype(jnp.float32)
    labels = labels.astype(jnp.float32)
    diff = scores[:, :, None] - scores[:, None, :]
    mask = (labels[:, None, :] - labels[:, :, None] > 0).astype(jnp.float32)
    return jnp.log(jnp.sum(jnp.exp(diff) * mask) + 1.0)


if __name__ == "__main__":
    key = jax.random.PRNGKey(0)
    k_s, k_l, k_r, k_s1 = jax.random.split(key, 4)

    B, C = 4, 10  # small shapes; exercises lane padding of the class axis to 128
    scores = jax.random.normal(k_s, (B, C), dtype=jnp.float32)
    labels_binary = (jax.random.uniform(k_l, (B, C)) > 0.5).astype(jnp.float32)

    # Multi-hot labels.
    loss = jax.block_until_ready(lsep_loss(scores, labels_binary, reduction="mean"))
    ref = _lsep_ref(scores, labels_binary)
    assert jnp.allclose(loss, ref, rtol=1e-5, atol=1e-5), (loss, ref)

    # Arbitrary (non-binary) label values.
    labels_rank = jnp.floor(jax.random.uniform(k_r, (B, C)) * 4.0)
    loss_rank = jax.block_until_ready(lsep_loss(scores, labels_rank, reduction="mean"))
    ref_rank = _lsep_ref(scores, labels_rank)
    assert jnp.allclose(loss_rank, ref_rank, rtol=1e-5, atol=1e-5), (loss_rank, ref_rank)

    # B == 1 path (odd batch -> i axis split into 2 parallel chunks for megacore).
    scores1 = jax.random.normal(k_s1, (1, C), dtype=jnp.float32)
    labels1 = labels_binary[:1]
    loss1 = jax.block_until_ready(lsep_loss(scores1, labels1, reduction="none"))
    ref1 = _lsep_ref(scores1, labels1)
    assert jnp.allclose(loss1, ref1, rtol=1e-5, atol=1e-5), (loss1, ref1)

    print("KERNEL_OK")
</pallas_src>

<mosaic_0001>
module attributes {stable_mosaic.version = 11 : i64} {
  func.func @_lsep_kernel(%arg0: i32, %arg1: i32, %arg2: memref<4x128xf32, #tpu.memory_space<smem>>, %arg3: memref<4x128xf32, #tpu.memory_space<smem>>, %arg4: memref<1x1x128xf32, #tpu.memory_space<vmem>>, %arg5: memref<1x1x128xf32, #tpu.memory_space<vmem>>, %arg6: memref<1x1x1x1xf32, #tpu.memory_space<vmem>>) attributes {dimension_semantics = [#tpu.dimension_semantics<parallel>, #tpu.dimension_semantics<parallel>], iteration_bounds = array<i64: 4, 1>, scalar_prefetch = 2 : i64, scratch_operands = 0 : i64, tpu.core_type = #tpu.core_type<tc>, window_params = [{transform_indices = @transform_0, window_bounds = array<i64: 1, 1, 128>}, {transform_indices = @transform_1, window_bounds = array<i64: 1, 1, 128>}, {transform_indices = @transform_2, window_bounds = array<i64: 1, 1, 1, 1>}]} {
    %c0 = arith.constant 0 : index
    %c0_0 = arith.constant 0 : index
    %c0_1 = arith.constant 0 : index
    %0 = vector.load %arg4[%c0, %c0_0, %c0_1] : memref<1x1x128xf32, #tpu.memory_space<vmem>>, vector<1x1x128xf32>
    %1 = vector.shape_cast %0 : vector<1x1x128xf32> to vector<1x128xf32>
    %c0_2 = arith.constant 0 : index
    %c0_3 = arith.constant 0 : index
    %c0_4 = arith.constant 0 : index
    %2 = vector.load %arg5[%c0_2, %c0_3, %c0_4] : memref<1x1x128xf32, #tpu.memory_space<vmem>>, vector<1x1x128xf32>
    %3 = vector.shape_cast %2 : vector<1x1x128xf32> to vector<1x128xf32>
    %4 = tpu.iota {dimensions = array<i32: 0>} : vector<1x128xi32>
    %c128_i32 = arith.constant 128 : i32
    %5 = vector.broadcast %c128_i32 : i32 to vector<1x128xi32>
    %6 = arith.muli %4, %5 : vector<1x128xi32>
    %7 = tpu.iota {dimensions = array<i32: 1>} : vector<1x128xi32>
    %8 = arith.addi %6, %7 : vector<1x128xi32>
    %c10_i32 = arith.constant 10 : i32
    %9 = vector.broadcast %c10_i32 : i32 to vector<1x128xi32>
    %10 = arith.cmpi slt, %8, %9 : vector<1x128xi32>
    %cst = arith.constant 0.000000e+00 : f32
    %cst_5 = arith.constant 3.000000e+38 : f32
    %11 = arith.subf %cst, %cst_5 : f32
    %12 = vector.broadcast %11 : f32 to vector<1x128xf32>
    %13 = arith.select %10, %1, %12 : vector<1x128xi1>, vector<1x128xf32>
    %14 = vector.shape_cast %13 : vector<1x128xf32> to vector<1x1x128xf32>
    %cst_6 = arith.constant dense<0xFF800000> : vector<1xf32>
    %15 = vector.multi_reduction <maximumf>, %14, %cst_6 [1, 2] : vector<1x1x128xf32> to vector<1xf32>
    %16 = vector.shape_cast %15 : vector<1xf32> to vector<1x1x1xf32>
    %17 = vector.extract %16[0, 0, 0] : f32 from vector<1x1x1xf32>
    %18 = vector.broadcast %17 : f32 to vector<1x1xf32>
    %cst_7 = arith.constant 3.000000e+38 : f32
    %19 = vector.broadcast %cst_7 : f32 to vector<1x128xf32>
    %20 = arith.select %10, %1, %19 : vector<1x128xi1>, vector<1x128xf32>
    %21 = vector.shape_cast %20 : vector<1x128xf32> to vector<1x1x128xf32>
    %cst_8 = arith.constant dense<0x7F800000> : vector<1xf32>
    %22 = vector.multi_reduction <minimumf>, %21, %cst_8 [1, 2] : vector<1x1x128xf32> to vector<1xf32>
    %23 = vector.shape_cast %22 : vector<1xf32> to vector<1x1x1xf32>
    %24 = vector.extract %23[0, 0, 0] : f32 from vector<1x1x1xf32>
    %25 = vector.broadcast %24 : f32 to vector<1x1xf32>
    %26 = arith.addf %18, %25 : vector<1x1xf32>
    %cst_9 = arith.constant 5.000000e-01 : f32
    %27 = vector.broadcast %cst_9 : f32 to vector<1x1xf32>
    %28 = arith.mulf %27, %26 : vector<1x1xf32>
    %29 = vector.broadcast %28 : vector<1x1xf32> to vector<1x128xf32>
    %30 = arith.subf %29, %1 : vector<1x128xf32>
    %cst_10 = arith.constant -8.800000e+01 : f32
    %cst_11 = arith.constant 8.800000e+01 : f32
    %31 = vector.broadcast %cst_10 : f32 to vector<1x128xf32>
    %32 = arith.maximumf %31, %30 : vector<1x128xf32>
    %33 = vector.broadcast %cst_11 : f32 to vector<1x128xf32>
    %34 = arith.minimumf %33, %32 : vector<1x128xf32>
    %35 = math.exp %34 : vector<1x128xf32>
    %cst_12 = arith.constant 0.000000e+00 : f32
    %36 = vector.broadcast %cst_12 : f32 to vector<1x128xf32>
    %37 = arith.select %10, %35, %36 : vector<1x128xi1>, vector<1x128xf32>
    %c10_i32_13 = arith.constant 10 : i32
    %38 = arith.muli %arg1, %c10_i32_13 : i32
    %c10_i32_14 = arith.constant 10 : i32
    %39 = arith.addi %38, %c10_i32_14 : i32
    %c10_i32_15 = arith.constant 10 : i32
    %40 = arith.minsi %39, %c10_i32_15 : i32
    %cst_16 = arith.constant 0.000000e+00 : f32
    %41 = vector.broadcast %cst_16 : f32 to vector<1x128xf32>
    %42 = arith.subi %40, %38 : i32
    %43 = arith.addi %38, %42 : i32
    %c1_i32 = arith.constant 1 : i32
    %44 = scf.for %arg7 = %38 to %43 step %c1_i32 iter_args(%arg8 = %41) -> (vector<1x128xf32>)  : i32 {
      %53 = arith.index_cast %arg0 : i32 to index
      %54 = arith.index_cast %arg7 : i32 to index
      %55 = memref.load %arg3[%53, %54] : memref<4x128xf32, #tpu.memory_space<smem>>
      %56 = arith.index_cast %arg0 : i32 to index
      %57 = arith.index_cast %arg7 : i32 to index
      %58 = memref.load %arg2[%56, %57] : memref<4x128xf32, #tpu.memory_space<smem>>
      %59 = vector.broadcast %58 : f32 to vector<1x1xf32>
      %60 = arith.subf %59, %28 : vector<1x1xf32>
      %cst_22 = arith.constant -8.800000e+01 : f32
      %cst_23 = arith.constant 8.800000e+01 : f32
      %61 = vector.broadcast %cst_22 : f32 to vector<1x1xf32>
      %62 = arith.maximumf %61, %60 : vector<1x1xf32>
      %63 = vector.broadcast %cst_23 : f32 to vector<1x1xf32>
      %64 = arith.minimumf %63, %62 : vector<1x1xf32>
      %65 = math.exp %64 : vector<1x1xf32>
      %66 = vector.broadcast %55 : f32 to vector<1x128xf32>
      %67 = arith.cmpf ogt, %3, %66 : vector<1x128xf32>
      %cst_24 = arith.constant 0.000000e+00 : f32
      %68 = vector.broadcast %cst_24 : f32 to vector<1x128xf32>
      %69 = arith.select %67, %37, %68 : vector<1x128xi1>, vector<1x128xf32>
      %70 = vector.broadcast %65 : vector<1x1xf32> to vector<1x128xf32>
      %71 = arith.mulf %69, %70 : vector<1x128xf32>
      %72 = arith.addf %arg8, %71 : vector<1x128xf32>
      scf.yield %72 : vector<1x128xf32>
    }
    %45 = vector.shape_cast %44 : vector<1x128xf32> to vector<1x1x128xf32>
    %cst_17 = arith.constant dense<0.000000e+00> : vector<1xf32>
    %46 = vector.multi_reduction <add>, %45, %cst_17 [1, 2] : vector<1x1x128xf32> to vector<1xf32>
    %47 = vector.shape_cast %46 : vector<1xf32> to vector<1x1x1xf32>
    %48 = vector.extract %47[0, 0, 0] : f32 from vector<1x1x1xf32>
    %49 = vector.broadcast %48 : f32 to vector<1x1xf32>
    %c0_18 = arith.constant 0 : index
    %c0_19 = arith.constant 0 : index
    %c0_20 = arith.constant 0 : index
    %c0_21 = arith.constant 0 : index
    %50 = vector.load %arg6[%c0_18, %c0_19, %c0_20, %c0_21] : memref<1x1x1x1xf32, #tpu.memory_space<vmem>>, vector<1x1x1x1xf32>
    %51 = vector.shape_cast %50 : vector<1x1x1x1xf32> to vector<1x1xf32>
    %52 = vector.shape_cast %49 : vector<1x1xf32> to vector<1x1x1x1xf32>
    tpu.vector_store %arg6[%c0_18, %c0_19, %c0_20, %c0_21], %52 {strides = array<i32>} : memref<1x1x1x1xf32, #tpu.memory_space<vmem>>, vector<1x1x1x1xf32>,
    return
  }
  func.func @transform_0(%arg0: i32, %arg1: i32, %arg2: memref<4x128xf32, #tpu.memory_space<smem>>, %arg3: memref<4x128xf32, #tpu.memory_space<smem>>) -> (i32, i32, i32) {
    %c0_i32 = arith.constant 0 : i32
    %c0_i32_0 = arith.constant 0 : i32
    %c0_i32_1 = arith.constant 0 : i32
    return %arg0, %c0_i32, %c0_i32_0 : i32, i32, i32
  }
  func.func @transform_1(%arg0: i32, %arg1: i32, %arg2: memref<4x128xf32, #tpu.memory_space<smem>>, %arg3: memref<4x128xf32, #tpu.memory_space<smem>>) -> (i32, i32, i32) {
    %c0_i32 = arith.constant 0 : i32
    %c0_i32_0 = arith.constant 0 : i32
    %c0_i32_1 = arith.constant 0 : i32
    return %arg0, %c0_i32, %c0_i32_0 : i32, i32, i32
  }
  func.func @transform_2(%arg0: i32, %arg1: i32, %arg2: memref<4x128xf32, #tpu.memory_space<smem>>, %arg3: memref<4x128xf32, #tpu.memory_space<smem>>) -> (i32, i32, i32, i32) {
    %c0_i32 = arith.constant 0 : i32
    %c0_i32_0 = arith.constant 0 : i32
    %c0_i32_1 = arith.constant 0 : i32
    return %arg0, %arg1, %c0_i32, %c0_i32_0 : i32, i32, i32, i32
  }
}

</mosaic_0001>

<bundles_post_ra>
// kernel: tpu_custom_call.1
= control target key start
LH: loop header
LB: loop body
LE: loop exit
PB: predicated region body
PF: predicated region fallthrough
CT: control target
= control target key end

     0   :  { %s576_s0 = inlined_call_operand.hbm [shape: f32[4,128], index: 0, kind: input, shape index: {}]   ;;  %s577_s2 = inlined_call_operand.vmem [shape: f32[4,1,128], index: 2, kind: input, shape index: {}]   ;;  %s578_s3 = inlined_call_operand.vmem [shape: f32[4,1,128], index: 3, kind: input, shape index: {}]   ;;  %s579_s4 = inlined_call_operand.vmem [shape: f32[4,1,1,1], index: 4, kind: output, shape index: {}]   ;;  %s580_s1 = inlined_call_operand.hbm [shape: f32[4,128], index: 1, kind: input, shape index: {}]  }
   0x1   :  { %s403_s17 = scalar_lea.hbm %s576_s0, 64 }
   0x2   :  { %p404_p0 = scmp.ne.s32.totalorder %s576_s0, %s403_s17  ;;  %p407_p1 = scmp.lt.u32.totalorder %s403_s17, %s576_s0 }
   0x4   :  { %p409_p2 = pnand %p407_p1, %p404_p0 }
   0x6   :  { %412 = shalt.err (!%p409_p2)  }
   0x7   :  { %s465_s22 = smov [#allocation3]   ;;  %s413_s27 = scalar_lea.hbm %s580_s1, 64 }
   0x8   :  { %10 = dma.hbm_to_smem %s576_s0, 64, %s465_s22, [#allocation2] }
   0x9   :  { %p414_p3 = scmp.ne.s32.totalorder %s580_s1, %s413_s27  ;;  %p417_p4 = scmp.lt.u32.totalorder %s413_s27, %s580_s1 }
   0xb   :  { %p419_p5 = pnand %p417_p4, %p414_p3 }
   0xd   :  { %422 = shalt.err (!%p419_p5)  }
   0xe   :  { %s466_s6 = smov [#allocation4]  }
   0xf   :  { %12 = dma.hbm_to_smem %s580_s1, 64, %s466_s6, [#allocation2] }
  0x10   :  { %443 = dma.done.wait [#allocation2], 128 }
  0x11   :  { %444 = vsyncadd [#allocation2], 4294967168 }
  0x12   :  { %14 = sfence }
  0x13   :  { %s516_s0 = smov 0   ;;  %s518_s9 = smov 0  }
  0x14   :  { %s520_s10 = smov 0  }
  0x15 LB: > { %s32_s1 = sadd.s32 1, %s451_s9  ;;  %p345_p6 = scmp.ge.s32.totalorder %s455_s10, 1  ;;  %s455_s10 = sphi %s520_s10, %s20_s10   ;;  %s451_s9 = sphi %s518_s9, %s582_s9   ;;  %s447_s0 = sphi %s516_s0, %s581_s0  }
  0x16   : > { %p34_p7 = scmp.ge.s32.totalorder %s32_s1, 4  ;;  %p140_p8 = scmp.lt.s32.totalorder %s455_s10, 5 }
  0x18   : > { %s584_s1 = smov (%p34_p7, %s32_s1), 0  ;;  %p141_p9 = pnand %p345_p6, %p140_p8 }
  0x19   : > { %p164_p10 = scmp.lt.s32.totalorder (!%p141_p9), %s447_s0, 3  ;;  %v178_v0 = vlaneseq (!%p141_p9)  ;;  %vm186_vm0 = vcmask (!%p141_p9), 1040384   ;;  %v457_v34 = vmov (!%p141_p9), 0.0   ;;  %s461_s23 = smov (!%p141_p9), 0  }
  0x1a   : > { %144 = sbr.rel (%p141_p9) target bundleno = 510 (0x1fe), region = 28 }
  0x1b   : > { %v179_v1 = vshrl.u32 (!%p141_p9), %v178_v0, 7  ;;  %v182_v2 = vand.u32 (!%p141_p9), 127, %v178_v0 }
  0x1d   : > { %v180_v3 = vmul.u32 (!%p141_p9), 128, %v179_v1 }
  0x1f   : > { %v183_v6 = vadd.s32 (!%p141_p9), %v182_v2, %v180_v3 }
  0x21   : > { %s538_s11 = scalar_select %p164_p10, %s447_s0, 3  ;;  %vm184_vm1 = vcmp.lt.s32.totalorder %v183_v6, 10 }
  0x23   : > { %s166_s14 = scalar_lea.vmem %s577_s2, %s538_s11  ;;  %s169_s17 = scalar_lea.vmem %s578_s3, %s538_s11 }
  0x24   : > { %s175_s20 = scalar_lea.vmem %s579_s4, %s538_s11  ;;  %v552_v4 = vld [vmem:[%s169_s17] sm:$0x1] }
  0x25   : > { %v176_v5 = vld [vmem:[%s166_s14] sm:$0x1] }
  0x26   : > { %v185_v7 = vsel %vm184_vm1, %v176_v5, -3e+38  ;;  %v198_v8 = vsel %vm184_vm1, %v176_v5, 3e+38 }
  0x27   : > { %v187_v9 = vsel %vm186_vm0, %v185_v7, -inf  ;;  %v199_v10 = vsel %vm186_vm0, %v198_v8, inf }
  0x28   : > { %188 = vmax.xlane.f32.xlu0 %v187_v9 }
  0x2c   : > { %200 = vmin.xlane.f32.xlu0 %v199_v10 }
  0xb5   : > { %v189_v11 = vpop.xlane.xlu0 %188 }
  0xb6   : > { %v190_v12 = vrot.slane %v189_v11, 4 }
  0xb8   : > { %v191_v13 = vmax.f32 %v189_v11, %v190_v12 }
  0xb9   : > { %v201_v14 = vpop.xlane.xlu0 %200 }
  0xba   : > { %v192_v15 = vrot.slane %v191_v13, 2  ;;  %v202_v16 = vrot.slane %v201_v14, 4 }
  0xbc   : > { %v203_v17 = vmin.f32 %v201_v14, %v202_v16  ;;  %v193_v18 = vmax.f32 %v191_v13, %v192_v15 }
  0xbe   : > { %v204_v19 = vrot.slane %v203_v17, 2  ;;  %v194_v20 = vrot.slane %v193_v18, 1 }
  0xc0   : > { %v205_v21 = vmin.f32 %v203_v17, %v204_v19  ;;  %v195_v22 = vmax.f32 %v193_v18, %v194_v20 }
  0xc2   : > { %351 = vpush %v195_v22  ;;  %v206_v23 = vrot.slane %v205_v21, 1 }
  0xc4   : > { %v207_v24 = vmin.f32 %v205_v21, %v206_v23 }
  0xc6   : > { %353 = vpush %v207_v24 }
  0xf3   : > { %s352_s21 = spop %351 }
  0xf4   : > { %v197_v25 = vstv %s352_s21 }
  0xf7   : > { %s354_s22 = spop %353 }
  0xf8   : > { %v209_v26 = vstv %s354_s22 }
  0xf9   : > { %v210_v27 = vadd.f32 %v209_v26, %v197_v25 }
  0xfb   : > { %v211_v28 = vmul.f32 0.5, %v210_v27 }
  0xfd   : > { %v212_v29 = vsub.f32 %v211_v28, %v176_v5 }
  0xff   : > { %v346_v30 = vclamps-f32 %v212_v29, 88.0 }
 0x101   : > { %v215_v31 = vmul.f32 1.442695, %v346_v30 }
 0x103   : > { %399 = vpow2.f32 %v215_v31 }
 0x10d   : > { %v400_v32 = vpop.eup %399 }
 0x10e   : > { %v217_v33 = vsel %vm184_vm1, %v400_v32, 0.0 }
 0x10f LB: >> { %s229_s24 = sshra.s32 %s463_s23, 7  ;;  %s234_s25 = sand.u32 127, %s463_s23  ;;  %s463_s23 = sphi %s461_s23, %s225_s23   ;;  %v459_v34 = vphi %v457_v34, %v458_v34  }
 0x110   : >> { %s231_s26 = sadd.s32 %s447_s0, %s229_s24  ;;  %s225_s23 = sadd.s32 1, %s463_s23  }
 0x111   : >> { %s347_s27 = sshll.u32 %s231_s26, 7  ;;  %p224_p11 = scmp.ge.s32.totalorder %s225_s23, 10 }
 0x112   : >> { %s235_s28 = sadd.s32 %s347_s27, %s234_s25  ;;  %vm260_vm3 = vcmask (%p224_p11), 0  }
 0x113   : >> { %s237_s29 = sld [smem:[#allocation3 + %s235_s28]] }
 0x114   : >> { %s236_s30 = sld [smem:[#allocation4 + %s235_s28]] }
 0x119   : >> { %v238_v35 = vstv %s237_s29 }
 0x11a   : >> { %v239_v36 = vsub.f32 %v238_v35, %v211_v28  ;;  %v244_v39 = vstv %s236_s30 }
 0x11b   : >> { %vm245_vm2 = vcmp.gt.f32.partialorder %v552_v4, %v244_v39 }
 0x11c   : >> { %v348_v37 = vclamps-f32 %v239_v36, 88.0  ;;  %v246_v40 = vsel %vm245_vm2, %v217_v33, 0.0 }
 0x11e   : >> { %v242_v38 = vmul.f32 1.442695, %v348_v37 }
 0x120   : >> { %401 = vpow2.f32 %v242_v38 }
 0x129   : > { %227 = sbr.rel (!%p224_p11) target bundleno = 271 (0x10f), region = 68 }
 0x12a   : >> { %v402_v41 = vpop.eup %401 }
 0x12b   : >> { %v247_v42 = vmul.f32 %v402_v41, %v246_v40 }
 0x12d   : >> { %v248_v43 = vadd.f32 %v459_v34, %v247_v42  }
 0x12f   : >> { %v458_v34 = vmov %v248_v43   ;;  %v249_v44 = vsel (%p224_p11), %vm186_vm0, %v248_v43, 0.0 }
 0x130   : > { %250 = vadd.xlane.f32.xlu0 %v249_v44 }
 0x1bd   : > { %v251_v45 = vpop.xlane.xlu0 %250 }
 0x1be   : > { %v252_v46 = vrot.slane %v251_v45, 4 }
 0x1c0   : > { %v253_v47 = vadd.f32 %v252_v46, %v251_v45 }
 0x1c2   : > { %v254_v48 = vrot.slane %v253_v47, 2 }
 0x1c4   : > { %v255_v49 = vadd.f32 %v254_v48, %v253_v47 }
 0x1c6   : > { %v256_v50 = vrot.slane %v255_v49, 1 }
 0x1c8   : > { %v257_v51 = vadd.f32 %v256_v50, %v255_v49 }
 0x1ca   : > { %355 = vpush %v257_v51 }
 0x1fb   : > { %s356_s5 = spop %355 }
 0x1fc   : > { %v259_v52 = vstv %s356_s5 }
 0x1fd   : > { %261 = vst.msk [vmem:[%s175_s20] sm:$0x1] %vm260_vm3, %v259_v52 }
 0x1fe PF: > { %s20_s10 = sadd.s32 1, %s455_s10   ;;  %s581_s0 = smov %s451_s9 }
 0x1ff   : > { %p17_p12 = scmp.ge.s32.totalorder %s20_s10, 6   ;;  %s582_s9 = smov %s584_s1 }
 0x201   :  { %19 = sbr.rel (!%p17_p12) target bundleno = 21 (0x15), region = 79 }

</bundles_post_ra>
